<compile_context>
chip_gen: v7x
topology: tpu7x:2x2x1
jax: 0.10.0
libtpu: 0.0.40
codegen_flags: <defaults>
</compile_context>

<pallas_src>
import jax
import jax.numpy as jnp
from jax.experimental import pallas as pl
from jax.experimental.pallas import tpu as pltpu

_LANE_BLOCK_CAP = 8192  # columns per grid step once batch is folded into lanes


def _round_up(x, m):
    return ((x + m - 1) // m) * m


def _complex_concat_add_kernel(p_ref, w_ref, ab_ref, ac_ref):
    # p_ref:  (10, NBLK)        im2col patches (9 taps + ones row), batch folded into lanes
    # w_ref:  (Crows, 10)       stacked [conv_a; conv_b; conv_c; zero-pad] weights, bias in col 9
    # ab_ref: (Cout, NBLK)      a1 + b
    # ac_ref: (2, Cout, NBLK)   [a1 ; c]  (batch concat assembled in the wrapper)
    cout = ab_ref.shape[0]

    # Single fused MXU matmul for all three convs (bias folded in via ones row).
    y = jnp.dot(w_ref[...], p_ref[...], preferred_element_type=jnp.float32)

    a1 = jnp.maximum(y[0:cout], 0.0)                       # ReLU
    b_pre = y[cout:2 * cout]
    b_val = jnp.where(b_pre >= 0.0, b_pre, 0.01 * b_pre)   # LeakyReLU(0.01)
    c = jnp.maximum(y[2 * cout:3 * cout], 0.0)             # ReLU

    ab_ref[...] = a1 + b_val
    ac_ref[0] = a1
    ac_ref[1] = c


def complex_concat_add(x, wa, ba, wb, bb, wc, bc):
    """x: [B, 1, H, W] float32; w*: [Cout, 1, 3, 3]; b*: [Cout]."""
    B, cin, H, W = x.shape
    assert cin == 1
    HW = H * W
    N = B * HW
    Cout = wa.shape[0]
    K = 10                                   # 9 taps + 1 ones row (bias)
    Crows = _round_up(3 * Cout, 8)           # 60 -> 64 sublanes

    # Lane-chunking: one step at small N, 8192-column chunks for large N.
    nblk = min(_round_up(N, 128), _LANE_BLOCK_CAP)
    n_pad = _round_up(N, nblk)
    grid = (n_pad // nblk,)

    # --- glue: im2col, 'same' zero padding, 3x3, stride 1; batch folded into lanes ---
    xs = x[:, 0].astype(jnp.float32)                         # [B, H, W]
    xp = jnp.pad(xs, ((0, 0), (1, 1), (1, 1)))               # [B, H+2, W+2]
    rows = [xp[:, dh:dh + H, dw:dw + W].reshape(N)
            for dh in range(3) for dw in range(3)]           # each [B*HW]
    patches = jnp.stack(rows + [jnp.ones((N,), jnp.float32)], axis=0)   # [10, N]
    patches = jnp.pad(patches, ((0, 0), (0, n_pad - N)))                # [10, n_pad]

    # --- glue: stack the three (Cout, 9) weights + bias column -> (Crows, 10) ---
    def pack(w, b):
        return jnp.concatenate(
            [w.reshape(Cout, 9), b.reshape(Cout, 1)], axis=1).astype(jnp.float32)

    w_all = jnp.concatenate([pack(wa, ba), pack(wb, bb), pack(wc, bc)], axis=0)
    w_all = jnp.pad(w_all, ((0, Crows - 3 * Cout), (0, 0)))             # [Crows, 10]

    ab_k, ac_k = pl.pallas_call(
        _complex_concat_add_kernel,
        out_shape=(
            jax.ShapeDtypeStruct((Cout, n_pad), jnp.float32),
            jax.ShapeDtypeStruct((2, Cout, n_pad), jnp.float32),
        ),
        grid=grid,
        in_specs=[
            pl.BlockSpec((K, nblk), lambda i: (0, i)),
            pl.BlockSpec((Crows, K), lambda i: (0, 0)),
        ],
        out_specs=(
            pl.BlockSpec((Cout, nblk), lambda i: (0, i)),
            pl.BlockSpec((2, Cout, nblk), lambda i: (0, 0, i)),
        ),
        compiler_params=pltpu.CompilerParams(
            dimension_semantics=("arbitrary",)),   # tiny per-step work: don't shard megacore
    )(patches, w_all)

    # --- glue: back to NCHW / torch.cat layout ---
    ab = ab_k[:, :N].reshape(Cout, B, H, W).transpose(1, 0, 2, 3)
    ac = (ac_k[:, :, :N]
          .reshape(2, Cout, B, H, W)
          .transpose(0, 2, 1, 3, 4)
          .reshape(2 * B, Cout, H, W))             # rows [0:B] = a1, [B:2B] = c
    return ab, ac


def _reference(x, wa, ba, wb, bb, wc, bc):
    """Plain-JAX reference matching the PyTorch forward."""
    def conv(w, b):
        y = jax.lax.conv_general_dilated(
            x, w, window_strides=(1, 1), padding="SAME",
            dimension_numbers=("NCHW", "OIHW", "NCHW"))
        return y + b.reshape(1, -1, 1, 1)

    a1 = jnp.maximum(conv(wa, ba), 0.0)
    bp = conv(wb, bb)
    bv = jnp.where(bp >= 0.0, bp, 0.01 * bp)
    c = jnp.maximum(conv(wc, bc), 0.0)
    return a1 + bv, jnp.concatenate([a1, c], axis=0)


if __name__ == "__main__":
    key = jax.random.PRNGKey(0)
    ks = jax.random.split(key, 7)

    B, H, W, Cout = 2, 16, 16, 20
    bound = 1.0 / 3.0  # kaiming-uniform-style bound for fan_in = 1*3*3

    wa = jax.random.uniform(ks[0], (Cout, 1, 3, 3), jnp.float32, -bound, bound)
    ba = jax.random.uniform(ks[1], (Cout,), jnp.float32, -bound, bound)
    wb = jax.random.uniform(ks[2], (Cout, 1, 3, 3), jnp.float32, -bound, bound)
    bb = jax.random.uniform(ks[3], (Cout,), jnp.float32, -bound, bound)
    wc = jax.random.uniform(ks[4], (Cout, 1, 3, 3), jnp.float32, -bound, bound)
    bc = jax.random.uniform(ks[5], (Cout,), jnp.float32, -bound, bound)

    x = jax.random.normal(ks[6], (B, 1, H, W), dtype=jnp.float32)

    ab, ac = jax.jit(complex_concat_add)(x, wa, ba, wb, bb, wc, bc)
    jax.block_until_ready((ab, ac))

    ab_ref, ac_ref = _reference(x, wa, ba, wb, bb, wc, bc)
    assert ab.shape == (B, Cout, H, W) and ac.shape == (2 * B, Cout, H, W)
    assert jnp.allclose(ab, ab_ref, rtol=1e-4, atol=1e-4)
    assert jnp.allclose(ac, ac_ref, rtol=1e-4, atol=1e-4)

    print("KERNEL_OK")
</pallas_src>

<mosaic_0001>
module attributes {stable_mosaic.version = 11 : i64} {
  func.func @_complex_concat_add_kernel(%arg0: i32, %arg1: memref<10x512xf32, #tpu.memory_space<vmem>>, %arg2: memref<64x10xf32, #tpu.memory_space<vmem>>, %arg3: memref<20x512xf32, #tpu.memory_space<vmem>>, %arg4: memref<2x20x512xf32, #tpu.memory_space<vmem>>) attributes {dimension_semantics = [#tpu.dimension_semantics<arbitrary>], iteration_bounds = array<i64: 1>, scalar_prefetch = 0 : i64, scratch_operands = 0 : i64, tpu.core_type = #tpu.core_type<tc>, window_params = [{transform_indices = @transform_0, window_bounds = array<i64: 10, 512>}, {pipeline_mode = #tpu.pipeline_mode<synchronous>, transform_indices = @transform_1, window_bounds = array<i64: 64, 10>}, {transform_indices = @transform_2, window_bounds = array<i64: 20, 512>}, {transform_indices = @transform_3, window_bounds = array<i64: 2, 20, 512>}]} {
    %c0 = arith.constant 0 : index
    %c0_0 = arith.constant 0 : index
    %0 = vector.load %arg2[%c0, %c0_0] : memref<64x10xf32, #tpu.memory_space<vmem>>, vector<64x10xf32>
    %c0_1 = arith.constant 0 : index
    %c0_2 = arith.constant 0 : index
    %1 = vector.load %arg1[%c0_1, %c0_2] : memref<10x512xf32, #tpu.memory_space<vmem>>, vector<10x512xf32>
    %cst = arith.constant dense<0.000000e+00> : vector<64x512xf32>
    %2 = tpu.matmul %0, %1, %cst {dimension_numbers = #tpu.dot_dimension_numbers<[1], [0], [0], [1], [0, 0, 1, 1], [], []>} : vector<64x10xf32>, vector<10x512xf32>, vector<64x512xf32> -> vector<64x512xf32>
    %3 = vector.extract_strided_slice %2 {offsets = [0, 0], sizes = [20, 512], strides = [1, 1]} : vector<64x512xf32> to vector<20x512xf32>
    %cst_3 = arith.constant 0.000000e+00 : f32
    %4 = vector.broadcast %cst_3 : f32 to vector<20x512xf32>
    %5 = arith.maximumf %3, %4 : vector<20x512xf32>
    %6 = vector.extract_strided_slice %2 {offsets = [20, 0], sizes = [20, 512], strides = [1, 1]} : vector<64x512xf32> to vector<20x512xf32>
    %cst_4 = arith.constant 0.000000e+00 : f32
    %7 = vector.broadcast %cst_4 : f32 to vector<20x512xf32>
    %8 = arith.cmpf oge, %6, %7 : vector<20x512xf32>
    %cst_5 = arith.constant 0.00999999977 : f32
    %9 = vector.broadcast %cst_5 : f32 to vector<20x512xf32>
    %10 = arith.mulf %9, %6 : vector<20x512xf32>
    %11 = arith.select %8, %6, %10 : vector<20x512xi1>, vector<20x512xf32>
    %12 = vector.extract_strided_slice %2 {offsets = [40, 0], sizes = [20, 512], strides = [1, 1]} : vector<64x512xf32> to vector<20x512xf32>
    %cst_6 = arith.constant 0.000000e+00 : f32
    %13 = vector.broadcast %cst_6 : f32 to vector<20x512xf32>
    %14 = arith.maximumf %12, %13 : vector<20x512xf32>
    %15 = arith.addf %5, %11 : vector<20x512xf32>
    %c0_7 = arith.constant 0 : index
    %c0_8 = arith.constant 0 : index
    %16 = vector.load %arg3[%c0_7, %c0_8] : memref<20x512xf32, #tpu.memory_space<vmem>>, vector<20x512xf32>
    tpu.vector_store %arg3[%c0_7, %c0_8], %15 {strides = array<i32>} : memref<20x512xf32, #tpu.memory_space<vmem>>, vector<20x512xf32>,
    %c0_9 = arith.constant 0 : index
    %c0_10 = arith.constant 0 : index
    %c0_11 = arith.constant 0 : index
    %17 = vector.load %arg4[%c0_9, %c0_10, %c0_11] : memref<2x20x512xf32, #tpu.memory_space<vmem>>, vector<1x20x512xf32>
    %18 = vector.shape_cast %17 : vector<1x20x512xf32> to vector<20x512xf32>
    %19 = vector.shape_cast %5 : vector<20x512xf32> to vector<1x20x512xf32>
    tpu.vector_store %arg4[%c0_9, %c0_10, %c0_11], %19 {strides = array<i32>} : memref<2x20x512xf32, #tpu.memory_space<vmem>>, vector<1x20x512xf32>,
    %c1 = arith.constant 1 : index
    %c0_12 = arith.constant 0 : index
    %c0_13 = arith.constant 0 : index
    %20 = vector.load %arg4[%c1, %c0_12, %c0_13] : memref<2x20x512xf32, #tpu.memory_space<vmem>>, vector<1x20x512xf32>
    %21 = vector.shape_cast %20 : vector<1x20x512xf32> to vector<20x512xf32>
    %22 = vector.shape_cast %14 : vector<20x512xf32> to vector<1x20x512xf32>
    tpu.vector_store %arg4[%c1, %c0_12, %c0_13], %22 {strides = array<i32>} : memref<2x20x512xf32, #tpu.memory_space<vmem>>, vector<1x20x512xf32>,
    return
  }
  func.func @transform_0(%arg0: i32) -> (i32, i32) {
    %c0_i32 = arith.constant 0 : i32
    %c0_i32_0 = arith.constant 0 : i32
    return %c0_i32, %arg0 : i32, i32
  }
  func.func @transform_1(%arg0: i32) -> (i32, i32) {
    %c0_i32 = arith.constant 0 : i32
    %c0_i32_0 = arith.constant 0 : i32
    %c0_i32_1 = arith.constant 0 : i32
    return %c0_i32, %c0_i32_0 : i32, i32
  }
  func.func @transform_2(%arg0: i32) -> (i32, i32) {
    %c0_i32 = arith.constant 0 : i32
    %c0_i32_0 = arith.constant 0 : i32
    return %c0_i32, %arg0 : i32, i32
  }
  func.func @transform_3(%arg0: i32) -> (i32, i32, i32) {
    %c0_i32 = arith.constant 0 : i32
    %c0_i32_0 = arith.constant 0 : i32
    %c0_i32_1 = arith.constant 0 : i32
    return %c0_i32, %c0_i32_0, %arg0 : i32, i32, i32
  }
}

</mosaic_0001>

<bundles_post_ra>
// kernel: complex_concat_add.1
= control target key start
LH: loop header
LB: loop body
LE: loop exit
PB: predicated region body
PF: predicated region fallthrough
CT: control target
= control target key end

     0   :  { %vm54_vm0 = vcmask 1041408   ;;  %vm501_vm1 = vmmov 1   ;;  %v502_v3 = vmov 0.0   ;;  %vm29_vm3 = vcmask 80896   ;;  %s820_s0 = inlined_call_operand.vmem [shape: f32[10,512], index: 0, kind: input, shape index: {}]   ;;  %s821_s1 = inlined_call_operand.vmem [shape: f32[64,10], index: 1, kind: input, shape index: {}]   ;;  %s822_s3 = inlined_call_operand.vmem [shape: f32[2,20,512], index: 3, kind: output, shape index: {1}]   ;;  %s823_s2 = inlined_call_operand.vmem [shape: f32[20,512], index: 2, kind: output, shape index: {0}]  }
   0x1   :  { %v22_v0 = vld [vmem:[%s820_s0 + $0x8] sm:$0xff]  ;;  %vm529_vm2 = vmpackc.low %vm54_vm0, %vm501_vm1  ;;  %131 = vmatprep.mubr.f32.mxu0 %v502_v3  ;;  %244 = vmatprep.mubr.f32.mxu1 %v502_v3  ;;  %v24_v5 = vld [vmem:[%s820_s0 + $0x18] sm:$0xff]  ;;  %vm365_vm8 = vcmask 1043456  }
   0x2   :  { %v26_v1 = vld [vmem:[%s820_s0 + $0x28] sm:$0x3]  ;;  %v28_v6 = vld [vmem:[%s820_s0 + $0x38] sm:$0x3]  ;;  %v21_v7 = vld [vmem:[%s820_s0] sm:$0xff] }
   0x3   :  { %v487_v4 = vpack.c.bf16 %v26_v1, %v22_v0  ;;  %v493_v8 = vpack.c.bf16 %v28_v6, %v24_v5  ;;  %v25_v9 = vld [vmem:[%s820_s0 + $0x20] sm:$0x3]  ;;  %v23_v10 = vld [vmem:[%s820_s0 + $0x10] sm:$0xff]  ;;  %v14_v15 = vld [vmem:[%s821_s1 + $0x8] sm:$0xff] }
   0x4   :  { %v27_v11 = vld [vmem:[%s820_s0 + $0x30] sm:$0x3]  ;;  %v490_v12 = vpack.c.bf16 %v25_v9, %v21_v7  ;;  %v13_v14 = vld [vmem:[%s821_s1] sm:$0xff]  ;;  %v16_v17 = vld [vmem:[%s821_s1 + $0x18] sm:$0xff] }
   0x5   :  { %489 = vmatprep.subr.msk.bf16.mxu0 %vm529_vm2, %v487_v4  ;;  %v496_v13 = vpack.c.bf16 %v27_v11, %v23_v10  ;;  %495 = vmatprep.subr.msk.bf16.mxu1 %vm529_vm2, %v493_v8  ;;  %v15_v16 = vld [vmem:[%s821_s1 + $0x10] sm:$0xff]  ;;  %v17_v18 = vld [vmem:[%s821_s1 + $0x20] sm:$0xff]  ;;  %v18_v19 = vld [vmem:[%s821_s1 + $0x28] sm:$0xff] }
   0x6   :  { %492 = vmatpush1.bf16.msk.msra.mxu0 %vm529_vm2, %v490_v12  ;;  %v19_v20 = vld [vmem:[%s821_s1 + $0x30] sm:$0xff]  ;;  %v20_v21 = vld [vmem:[%s821_s1 + $0x38] sm:$0xff] }
   0x7   :  { %498 = vmatpush1.bf16.msk.msra.mxu1 %vm529_vm2, %v496_v13 }
   0x9   :  { %457 = vmatmul.mubr.msk.f32.vlgmr.msra.gmra.mrb[0].mxu0 %vm29_vm3, %v13_v14 }
   0xa   :  { %467 = vmatmul.mubr.msk.f32.vlgmr.msra.gmra.mrb[0].mxu1 %vm29_vm3, %v13_v14  ;;  %137 = vmatprep.mubr.f32.mxu0 %v502_v3 }
   0xb   :  { %250 = vmatprep.mubr.f32.mxu1 %v502_v3 }
   0xd   :  { %458 = vmatmul.mubr.msk.f32.gmra.mrb[2].mxu0 %vm29_vm3, %v14_v15 }
   0xe   :  { %468 = vmatmul.mubr.msk.f32.gmra.mrb[2].mxu1 %vm29_vm3, %v14_v15  ;;  %143 = vmatprep.mubr.f32.mxu0 %v502_v3 }
   0xf   :  { %256 = vmatprep.mubr.f32.mxu1 %v502_v3 }
  0x11   :  { %459 = vmatmul.mubr.msk.f32.gmra.mrb[4].mxu0 %vm29_vm3, %v15_v16 }
  0x12   :  { %469 = vmatmul.mubr.msk.f32.gmra.mrb[4].mxu1 %vm29_vm3, %v15_v16  ;;  %149 = vmatprep.mubr.f32.mxu0 %v502_v3 }
  0x13   :  { %262 = vmatprep.mubr.f32.mxu1 %v502_v3 }
  0x15   :  { %460 = vmatmul.mubr.msk.f32.gmra.mrb[6].mxu0 %vm29_vm3, %v16_v17 }
  0x16   :  { %470 = vmatmul.mubr.msk.f32.gmra.mrb[6].mxu1 %vm29_vm3, %v16_v17  ;;  %155 = vmatprep.mubr.f32.mxu0 %v502_v3 }
  0x17   :  { %268 = vmatprep.mubr.f32.mxu1 %v502_v3 }
  0x19   :  { %461 = vmatmul.mubr.msk.f32.gmra.mrb[8].mxu0 %vm29_vm3, %v17_v18 }
  0x1a   :  { %471 = vmatmul.mubr.msk.f32.gmra.mrb[8].mxu1 %vm29_vm3, %v17_v18  ;;  %161 = vmatprep.mubr.f32.mxu0 %v502_v3 }
  0x1b   :  { %274 = vmatprep.mubr.f32.mxu1 %v502_v3 }
  0x1d   :  { %462 = vmatmul.mubr.msk.f32.gmra.mrb[10].mxu0 %vm29_vm3, %v18_v19 }
  0x1e   :  { %472 = vmatmul.mubr.msk.f32.gmra.mrb[10].mxu1 %vm29_vm3, %v18_v19  ;;  %167 = vmatprep.mubr.f32.mxu0 %v502_v3 }
  0x1f   :  { %280 = vmatprep.mubr.f32.mxu1 %v502_v3 }
  0x21   :  { %463 = vmatmul.mubr.msk.f32.gmra.mrb[12].mxu0 %vm29_vm3, %v19_v20 }
  0x22   :  { %473 = vmatmul.mubr.msk.f32.gmra.mrb[12].mxu1 %vm29_vm3, %v19_v20  ;;  %173 = vmatprep.mubr.f32.mxu0 %v502_v3 }
  0x23   :  { %286 = vmatprep.mubr.f32.mxu1 %v502_v3 }
  0x25   :  { %464 = vmatmul.mubr.msk.f32.gmra.mrb[14].mxu0 %vm29_vm3, %v20_v21 }
  0x26   :  { %474 = vmatmul.mubr.msk.f32.gmra.mrb[14].mxu1 %vm29_vm3, %v20_v21 }
  0xdc   :  { %v599_v22 = vpop.f32.mrb[0].mxu0 }
  0xdd   :  { %v601_v23 = vpop.f32.mrb[0].mxu1  ;;  %v293_v24 = vmax.f32 %v599_v22, 0.0  ;;  %v605_v26 = vpop.f32.mrb[1].mxu0 }
  0xde   :  { %v295_v25 = vmax.f32 %v601_v23, 0.0  ;;  %v607_v27 = vpop.f32.mrb[1].mxu1  ;;  %v294_v28 = vmax.f32 %v605_v26, 0.0 }
  0xdf   :  { %v296_v29 = vmax.f32 %v607_v27, 0.0  ;;  %422 = vst [vmem:[%s822_s3] sm:$0xff] %v293_v24 }
  0xe0   :  { %424 = vst [vmem:[%s822_s3 + $0x10] sm:$0xff] %v295_v25  ;;  %423 = vst [vmem:[%s822_s3 + $0x8] sm:$0xff] %v294_v28  ;;  %v631_v30 = vpop.f32.mrb[2].mxu0 }
  0xe1   :  { %425 = vst [vmem:[%s822_s3 + $0x18] sm:$0xff] %v296_v29  ;;  %v633_v31 = vpop.f32.mrb[2].mxu1  ;;  %v297_v32 = vmax.f32 %v631_v30, 0.0  ;;  %v637_v34 = vpop.f32.mrb[3].mxu0 }
  0xe2   :  { %v299_v33 = vmax.f32 %v633_v31, 0.0  ;;  %v639_v35 = vpop.f32.mrb[3].mxu1  ;;  %v298_v36 = vmax.f32 %v637_v34, 0.0 }
  0xe3   :  { %v300_v37 = vmax.f32 %v639_v35, 0.0  ;;  %426 = vst [vmem:[%s822_s3 + $0x20] sm:$0xff] %v297_v32 }
  0xe4   :  { %428 = vst [vmem:[%s822_s3 + $0x30] sm:$0xff] %v299_v33  ;;  %427 = vst [vmem:[%s822_s3 + $0x28] sm:$0xff] %v298_v36  ;;  %v663_v38 = vpop.f32.mrb[4].mxu0 }
  0xe5   :  { %429 = vst [vmem:[%s822_s3 + $0x38] sm:$0xff] %v300_v37  ;;  %v665_v39 = vpop.f32.mrb[4].mxu1  ;;  %v301_v40 = vmax.f32 %v663_v38, 0.0  ;;  %vm305_vm4 = vcmp.ge.f32.partialorder %v663_v38, 0.0  ;;  %v317_v41 = vmul.f32 0.01, %v663_v38 }
  0xe6   :  { %v303_v42 = vmax.f32 %v665_v39, 0.0  ;;  %v671_v43 = vpop.f32.mrb[5].mxu0  ;;  %vm307_vm5 = vcmp.ge.f32.partialorder %v665_v39, 0.0  ;;  %v319_v44 = vmul.f32 0.01, %v665_v39  ;;  %v677_v46 = vpop.f32.mrb[5].mxu1 }
  0xe7   :  { %v302_v45 = vmax.f32 %v671_v43, 0.0  ;;  %vm306_vm6 = vcmp.ge.f32.partialorder %v671_v43, 0.0  ;;  %v329_v47 = vsel %vm305_vm4, %v663_v38, %v317_v41  ;;  %430 = vst [vmem:[%s822_s3 + $0x40] sm:$0xf] %v301_v40  ;;  %v318_v48 = vmul.f32 0.01, %v671_v43 }
  0xe8   :  { %432 = vst [vmem:[%s822_s3 + $0x50] sm:$0xf] %v303_v42  ;;  %v304_v49 = vmax.f32 %v677_v46, 0.0  ;;  %vm308_vm7 = vcmp.ge.f32.partialorder %v677_v46, 0.0  ;;  %v366_v50 = vrot.slane %v329_v47, 4  ;;  %v331_v51 = vsel %vm307_vm5, %v665_v39, %v319_v44  ;;  %v151_v53 = vpop.f32.mrb[6].mxu0 }
  0xe9   :  { %431 = vst [vmem:[%s822_s3 + $0x48] sm:$0xf] %v302_v45  ;;  %v320_v52 = vmul.f32 0.01, %v677_v46  ;;  %v264_v54 = vpop.f32.mrb[6].mxu1  ;;  %v372_v55 = vrot.slane %v331_v51, 4  ;;  %v330_v56 = vsel %vm306_vm6, %v671_v43, %v318_v48 }
  0xea   :  { %433 = vst [vmem:[%s822_s3 + $0x58] sm:$0xf] %v304_v49  ;;  %vm309_vm9 = vcmp.ge.f32.partialorder %v151_v53, 0.0  ;;  %v321_v57 = vmul.f32 0.01, %v151_v53  ;;  %v153_v58 = vpop.f32.mrb[7].mxu0 }
  0xeb   :  { %v266_v59 = vpop.f32.mrb[7].mxu1  ;;  %v369_v60 = vrot.slane %v330_v56, 4  ;;  %v332_v61 = vsel %vm308_vm7, %v677_v46, %v320_v52  ;;  %vm311_vm10 = vcmp.ge.f32.partialorder %v264_v54, 0.0  ;;  %v323_v62 = vmul.f32 0.01, %v264_v54 }
  0xec   :  { %v375_v63 = vrot.slane %v332_v61, 4  ;;  %v333_v0 = vsel %vm309_vm9, %v151_v53, %v321_v57  ;;  %vm310_vm11 = vcmp.ge.f32.partialorder %v153_v58, 0.0  ;;  %v322_v1 = vmul.f32 0.01, %v153_v58  ;;  %v157_v5 = vpop.f32.mrb[8].mxu0 }
  0xed   :  { %v367_v2 = vrot.slane %v333_v0, 4  ;;  %v335_v3 = vsel %vm311_vm10, %v264_v54, %v323_v62  ;;  %vm312_vm12 = vcmp.ge.f32.partialorder %v266_v59, 0.0  ;;  %v324_v4 = vmul.f32 0.01, %v266_v59  ;;  %v270_v6 = vpop.f32.mrb[8].mxu1  ;;  %v159_v10 = vpop.f32.mrb[9].mxu0 }
  0xee   :  { %v373_v7 = vrot.slane %v335_v3, 4  ;;  %v334_v8 = vsel %vm310_vm11, %v153_v58, %v322_v1  ;;  %vm313_vm13 = vcmp.ge.f32.partialorder %v157_v5, 0.0  ;;  %v325_v9 = vmul.f32 0.01, %v157_v5  ;;  %v272_v11 = vpop.f32.mrb[9].mxu1 }
  0xef   :  { %v368_v12 = vsel %vm365_vm8, %v366_v50, %v367_v2  ;;  %v370_v13 = vrot.slane %v334_v8, 4  ;;  %v712_v14 = vsel %vm312_vm12, %v266_v59, %v324_v4  ;;  %vm315_vm14 = vcmp.ge.f32.partialorder %v270_v6, 0.0 }
  0xf0   :  { %v398_v15 = vadd.f32 %v368_v12, %v293_v24  ;;  %v374_v16 = vsel %vm365_vm8, %v372_v55, %v373_v7  ;;  %v376_v17 = vrot.slane %v712_v14, 4  ;;  %v337_v18 = vsel %vm313_vm13, %v157_v5, %v325_v9  ;;  %v163_v44 = vpop.f32.mrb[10].mxu0 }
  0xf1   :  { %v400_v19 = vadd.f32 %v374_v16, %v295_v25  ;;  %v371_v20 = vsel %vm365_vm8, %v369_v60, %v370_v13  ;;  %v378_v21 = vrot.slane %v337_v18, 4  ;;  %v327_v41 = vmul.f32 0.01, %v270_v6  ;;  %v276_v47 = vpop.f32.mrb[10].mxu1  ;;  %v165_v50 = vpop.f32.mrb[11].mxu0 }
  0xf2   :  { %410 = vst [vmem:[%s823_s2] sm:$0xff] %v398_v15  ;;  %v399_v22 = vadd.f32 %v371_v20, %v294_v28  ;;  %v377_v24 = vsel %vm365_vm8, %v375_v63, %v376_v17  ;;  %vm314_vm15 = vcmp.ge.f32.partialorder %v159_v10, 0.0  ;;  %v326_v48 = vmul.f32 0.01, %v159_v10  ;;  %v278_v23 = vpop.f32.mrb[11].mxu1 }
  0xf3   :  { %412 = vst [vmem:[%s823_s2 + $0x10] sm:$0xff] %v400_v19  ;;  %v401_v25 = vadd.f32 %v377_v24, %v296_v29  ;;  %v379_v51 = vsel %vm365_vm8, %v367_v2, %v378_v21  ;;  %v406_v52 = vadd.f32 %v378_v21, %v301_v40  ;;  %v339_v26 = vsel %vm315_vm14, %v270_v6, %v327_v41 }
  0xf4   :  { %411 = vst [vmem:[%s823_s2 + $0x8] sm:$0xff] %v399_v22  ;;  %v402_v28 = vadd.f32 %v379_v51, %v297_v32  ;;  %v382_v53 = vrot.slane %v339_v26, 4  ;;  %v338_v54 = vsel %vm314_vm15, %v159_v10, %v326_v48  ;;  %vm316_vm0 = vcmp.ge.f32.partialorder %v272_v11, 0.0  ;;  %v169_v55 = vpop.f32.mrb[12].mxu0 }
  0xf5   :  { %413 = vst [vmem:[%s823_s2 + $0x18] sm:$0xff] %v401_v25  ;;  %418 = vst [vmem:[%s823_s2 + $0x40] sm:$0xf] %v406_v52  ;;  %v380_v27 = vrot.slane %v338_v54, 4  ;;  %v328_v29 = vmul.f32 0.01, %v272_v11 }
  0xf6   :  { %v341_v38 = vmax.f32 %v163_v44, 0.0  ;;  %v343_v40 = vmax.f32 %v276_v47, 0.0  ;;  %414 = vst [vmem:[%s823_s2 + $0x20] sm:$0xff] %v402_v28  ;;  %v383_v30 = vsel %vm365_vm8, %v373_v7, %v382_v53  ;;  %v408_v32 = vadd.f32 %v382_v53, %v303_v42  ;;  %v282_v58 = vpop.f32.mrb[12].mxu1  ;;  %v171_v59 = vpop.f32.mrb[13].mxu0 }
  0xf7   :  { %v342_v56 = vmax.f32 %v165_v50, 0.0  ;;  %v344_v57 = vmax.f32 %v278_v23, 0.0  ;;  %v404_v60 = vadd.f32 %v383_v30, %v299_v33  ;;  %v381_v61 = vsel %vm365_vm8, %v370_v13, %v380_v27  ;;  %v284_v39 = vpop.f32.mrb[13].mxu1 }
  0xf8   :  { %v407_v62 = vadd.f32 %v380_v27, %v302_v45  ;;  %v340_v63 = vsel %vm316_vm0, %v272_v11, %v328_v29  ;;  %475 = vst [vmem:[%s822_s3 + $0x60] sm:$0xff] %v341_v38  ;;  %477 = vst [vmem:[%s822_s3 + $0x70] sm:$0xff] %v343_v40  ;;  %v403_v31 = vadd.f32 %v381_v61, %v298_v36  ;;  %v345_v42 = vmax.f32 %v169_v55, 0.0  ;;  %v175_v45 = vpop.f32.mrb[14].mxu0 }
  0xf9   :  { %420 = vst [vmem:[%s823_s2 + $0x50] sm:$0xf] %v408_v32  ;;  %v384_v33 = vrot.slane %v340_v63, 4  ;;  %476 = vst [vmem:[%s822_s3 + $0x68] sm:$0xff] %v342_v56  ;;  %v347_v43 = vmax.f32 %v282_v58, 0.0  ;;  %v346_v34 = vmax.f32 %v171_v59, 0.0 }
  0xfa   :  { %478 = vst [vmem:[%s822_s3 + $0x78] sm:$0xff] %v344_v57  ;;  %416 = vst [vmem:[%s823_s2 + $0x30] sm:$0xff] %v404_v60  ;;  %v348_v36 = vmax.f32 %v284_v39, 0.0  ;;  %v288_v0 = vpop.f32.mrb[14].mxu1  ;;  %v349_v3 = vmax.f32 %v175_v45, 0.0  ;;  %v177_v5 = vpop.f32.mrb[15].mxu0 }
  0xfb   :  { %419 = vst [vmem:[%s823_s2 + $0x48] sm:$0xf] %v407_v62  ;;  %415 = vst [vmem:[%s823_s2 + $0x28] sm:$0xff] %v403_v31  ;;  %v385_v1 = vsel %vm365_vm8, %v376_v17, %v384_v33  ;;  %v409_v2 = vadd.f32 %v384_v33, %v304_v49  ;;  %v351_v4 = vmax.f32 %v288_v0, 0.0  ;;  %v290_v6 = vpop.f32.mrb[15].mxu1  ;;  %v350_v46 = vmax.f32 %v177_v5, 0.0 }
  0xfc   :  { %479 = vst [vmem:[%s822_s3 + $0x80] sm:$0xff] %v345_v42  ;;  %481 = vst [vmem:[%s822_s3 + $0x90] sm:$0xff] %v347_v43  ;;  %v405_v7 = vadd.f32 %v385_v1, %v300_v37  ;;  %v352_v49 = vmax.f32 %v290_v6, 0.0 }
  0xfd   :  { %480 = vst [vmem:[%s822_s3 + $0x88] sm:$0xff] %v346_v34  ;;  %482 = vst [vmem:[%s822_s3 + $0x98] sm:$0xff] %v348_v36 }
  0xfe   :  { %421 = vst [vmem:[%s823_s2 + $0x58] sm:$0xf] %v409_v2  ;;  %483 = vst [vmem:[%s822_s3 + $0xa0] sm:$0xf] %v349_v3 }
  0xff   :  { %485 = vst [vmem:[%s822_s3 + $0xb0] sm:$0xf] %v351_v4  ;;  %417 = vst [vmem:[%s823_s2 + $0x38] sm:$0xff] %v405_v7 }
 0x100   :  { %484 = vst [vmem:[%s822_s3 + $0xa8] sm:$0xf] %v350_v46  ;;  %486 = vst [vmem:[%s822_s3 + $0xb8] sm:$0xf] %v352_v49 }

</bundles_post_ra>
